<compile_context>
chip_gen: v7x
topology: tpu7x:2x2x1
jax: 0.10.0
libtpu: 0.0.40
codegen_flags: <defaults>
</compile_context>

<pallas_src>
import functools

import jax
import jax.numpy as jnp
from jax.experimental import pallas as pl
from jax.experimental.pallas import tpu as pltpu


def _round_up(x, m):
    return (x + m - 1) // m * m


def _fit_tile(n_pad, target, align):
    """Largest t <= max(target, align) with t % align == 0 and n_pad % t == 0."""
    t = min(target, n_pad)
    t -= t % align
    t = max(t, align)
    while n_pad % t != 0:
        t -= align
    return t


def _vmem_limit_bytes():
    """Per-generation scoped-VMEM budget: ~52 MiB on v7x (64 MiB physical),
    ~110 MiB on v5e/v6e (128 MiB physical)."""
    try:
        cap = int(pltpu.get_tpu_info().vmem_capacity_bytes)
    except Exception:
        cap = 64 * 1024 * 1024
    return max(32 * 1024 * 1024, min(cap - 12 * 1024 * 1024, 110 * 1024 * 1024))


# --------------------------------------------------------------------------
# 1) Projection kernel: hh = (ELU?)(x) @ W_all  (bf16 MXU, f32 acc), stored
#    straight to bf16, plus e = hh @ A_cat giving [e_src | e_dst] for all
#    heads in a single lane-dense [rt, 2H] store.
# --------------------------------------------------------------------------
def _project_kernel(x_ref, w_ref, acat_ref, hh_ref, e_ref, *, apply_input_elu):
    x = x_ref[...]
    if apply_input_elu:
        # F.elu fused from the previous layer; clamp the exp arg so the
        # discarded branch does not burn EUP work / produce inf.
        x = jnp.where(x > 0, x, jnp.exp(jnp.minimum(x, 0.0)) - 1.0)
    hh = jnp.dot(x.astype(jnp.bfloat16), w_ref[...],
                 preferred_element_type=jnp.float32)      # [rt, H*F_out] f32
    hh_ref[...] = hh.astype(jnp.bfloat16)                 # bf16 directly to HBM
    # e[:, h] = <hh_h, a_src_h>, e[:, H+h] = <hh_h, a_dst_h>: one tiny MXU
    # matmul + one store (replaces 2H strided VPU reductions + narrow stores).
    e_ref[...] = jnp.dot(hh, acat_ref[...], preferred_element_type=jnp.float32)


# --------------------------------------------------------------------------
# 2) Attention kernel: src-tiled masked softmax + aggregation.
#    grid = (dst_tiles "parallel", src_tiles "arbitrary")
#    acc/l live in VMEM scratch; out (and alpha) blocks are resident across
#    the src axis and finalized at the last src step.
# --------------------------------------------------------------------------
def _attention_kernel(adj_ref, edst_ref, esrc_ref, maxs_ref, hh_ref, b_ref,
                      out_ref, *rest, heads, f_out, with_alpha, src_tile,
                      alpha_dtype, neg_slope=0.2):
    if with_alpha:
        alpha_ref, acc_ref, l_ref = rest
    else:
        acc_ref, l_ref = rest
        alpha_ref = None

    k = pl.program_id(1)
    nk = pl.num_programs(1)

    @pl.when(k == 0)
    def _():
        acc_ref[...] = jnp.zeros_like(acc_ref)
        l_ref[...] = jnp.zeros_like(l_ref)

    adj_f = adj_ref[...].astype(jnp.float32)      # int8 0/1 -> f32 mult. mask
    hh = hh_ref[...]                              # [tk, H*F_out] bf16
    col = pl.multiple_of(k * src_tile, 128)

    for h in range(heads):                        # static, small
        e_d = edst_ref[:, h:h + 1]                # [dt, 1]
        e_s = esrc_ref[h:h + 1, :]                # [1, tk]
        # Fixed stability bound: m_i = LeakyReLU(e_d_i + max_j e_s_j) >= every
        # logit of row i (LeakyReLU monotone); softmax shift-invariance keeps
        # the result exact, so no masked row-max pass and no running max.
        m_lin = e_d + maxs_ref[:, h:h + 1]        # [dt, 1]
        m = jnp.maximum(m_lin, neg_slope * m_lin)
        logits = e_d + e_s                        # broadcast add, no MXU
        logits = jnp.maximum(logits, neg_slope * logits)       # LeakyReLU(0.2)
        p = jnp.exp(logits - m) * adj_f           # [dt, tk] unnormalized
        l_ref[:, h:h + 1] += jnp.sum(p, axis=-1, keepdims=True)
        acc_ref[:, h * f_out:(h + 1) * f_out] += jnp.dot(
            p.astype(jnp.bfloat16), hh[:, h * f_out:(h + 1) * f_out],
            preferred_element_type=jnp.float32)
        if with_alpha:
            alpha_ref[h, :, pl.ds(col, src_tile)] = p.astype(alpha_dtype)

    @pl.when(k == nk - 1)
    def _():
        for h in range(heads):
            # Guard against an all-masked (padded) row; real rows always have
            # a self-loop.
            l = jnp.maximum(l_ref[:, h:h + 1], 1e-30)
            inv_l = pl.reciprocal(l, approx=False)
            out_ref[:, h * f_out:(h + 1) * f_out] = (
                acc_ref[:, h * f_out:(h + 1) * f_out] * inv_l
                + b_ref[:, h * f_out:(h + 1) * f_out])
            if with_alpha:
                # Normalize the resident alpha block in VMEM (no HBM re-read).
                alpha_ref[h, :, :] = (
                    alpha_ref[h, :, :].astype(jnp.float32) * inv_l
                ).astype(alpha_dtype)


# --------------------------------------------------------------------------
# One GATConv layer (operates on N_pad-padded arrays).
# --------------------------------------------------------------------------
def gat_conv(x_pad, adj_pad_i8, w, a_src, a_dst, bias, *, heads, f_out,
             n_valid, apply_input_elu, with_alpha, alpha_dtype=jnp.bfloat16,
             row_tile=1024, dst_tile=256, src_tile=512, vmem_limit=None):
    n_pad, f_in = x_pad.shape
    hf = heads * f_out
    if vmem_limit is None:
        vmem_limit = _vmem_limit_bytes()

    w_all = jnp.transpose(w, (1, 0, 2)).reshape(f_in, hf).astype(jnp.bfloat16)
    b_all = bias.reshape(1, hf).astype(jnp.float32)

    # A_cat[hf, 2H]: column h holds a_src[h] in rows h*F:(h+1)*F, column H+h
    # holds a_dst[h] -> e = hh @ A_cat gives [e_src | e_dst] per head.
    a_cat = jnp.zeros((hf, 2 * heads), jnp.float32)
    for h in range(heads):
        a_cat = a_cat.at[h * f_out:(h + 1) * f_out, h].set(a_src[h])
        a_cat = a_cat.at[h * f_out:(h + 1) * f_out, heads + h].set(a_dst[h])

    # ---- 1) projection ---------------------------------------------------
    rt = _fit_tile(n_pad, row_tile, 128)
    hh, e = pl.pallas_call(
        functools.partial(_project_kernel, apply_input_elu=apply_input_elu),
        out_shape=(jax.ShapeDtypeStruct((n_pad, hf), jnp.bfloat16),
                   jax.ShapeDtypeStruct((n_pad, 2 * heads), jnp.float32)),
        grid=(n_pad // rt,),
        in_specs=[
            pl.BlockSpec((rt, f_in), lambda i: (i, 0)),       # x tile
            pl.BlockSpec((f_in, hf), lambda i: (0, 0)),       # W_all (resident)
            pl.BlockSpec((hf, 2 * heads), lambda i: (0, 0)),  # A_cat (resident)
        ],
        out_specs=(
            pl.BlockSpec((rt, hf), lambda i: (i, 0)),         # hh (bf16)
            pl.BlockSpec((rt, 2 * heads), lambda i: (i, 0)),  # e
        ),
        compiler_params=pltpu.CompilerParams(
            dimension_semantics=("parallel",),
            vmem_limit_bytes=vmem_limit),
    )(x_pad, w_all, a_cat)

    e_src = e[:, :heads]                 # [N_pad, H]
    e_dst = e[:, heads:]                 # [N_pad, H]
    e_src_hn = e_src.T                   # tiny transpose -> [H, N_pad]
    # Stability bound over valid nodes only (padded rows excluded).
    max_esrc = jnp.max(e_src[:n_valid], axis=0, keepdims=True)   # [1, H]

    # ---- 2) attention: dst tiles (parallel) x src tiles (arbitrary) -------
    dt = _fit_tile(n_pad, dst_tile, 32)
    tk = _fit_tile(n_pad, src_tile, 128)

    out_shapes = [jax.ShapeDtypeStruct((n_pad, hf), jnp.float32)]
    out_specs = [pl.BlockSpec((dt, hf), lambda i, k: (i, 0))]
    if with_alpha:
        out_shapes.append(
            jax.ShapeDtypeStruct((heads, n_pad, n_pad), alpha_dtype))
        out_specs.append(
            pl.BlockSpec((heads, dt, n_pad), lambda i, k: (0, i, 0)))

    alpha_bytes = (heads * n_pad * n_pad * jnp.dtype(alpha_dtype).itemsize
                   if with_alpha else 0)
    cost = pl.CostEstimate(
        flops=int(2 * heads * n_pad * n_pad * f_out
                  + 8 * heads * n_pad * n_pad),
        transcendentals=int(heads * n_pad * n_pad),
        bytes_accessed=int(n_pad * n_pad                     # int8 adjacency
                           + alpha_bytes                     # alpha writeback
                           + (n_pad // dt) * n_pad * hf * 2  # hh re-reads
                           + n_pad * hf * 4                  # out write
                           + n_pad * heads * 12),
    )

    res = pl.pallas_call(
        functools.partial(_attention_kernel, heads=heads, f_out=f_out,
                          with_alpha=with_alpha, src_tile=tk,
                          alpha_dtype=alpha_dtype),
        out_shape=tuple(out_shapes),
        grid=(n_pad // dt, n_pad // tk),
        in_specs=[
            pl.BlockSpec((dt, tk), lambda i, k: (i, k)),        # adj (int8)
            pl.BlockSpec((dt, heads), lambda i, k: (i, 0)),     # e_dst tile
            pl.BlockSpec((heads, tk), lambda i, k: (0, k)),     # e_src tile
            pl.BlockSpec((1, heads), lambda i, k: (0, 0)),      # max_esrc
            pl.BlockSpec((tk, hf), lambda i, k: (k, 0)),        # hh (streams)
            pl.BlockSpec((1, hf), lambda i, k: (0, 0)),         # bias
        ],
        out_specs=tuple(out_specs),
        scratch_shapes=[pltpu.VMEM((dt, hf), jnp.float32),      # acc
                        pltpu.VMEM((dt, heads), jnp.float32)],  # l (row sums)
        compiler_params=pltpu.CompilerParams(
            dimension_semantics=("parallel", "arbitrary"),
            vmem_limit_bytes=vmem_limit),
        cost_estimate=cost,
    )(adj_pad_i8, e_dst, e_src_hn, max_esrc, hh, b_all)

    if with_alpha:
        out, alpha = res
        return out, alpha
    (out,) = res
    return out, None


# --------------------------------------------------------------------------
# Full GAT.forward: conv1 (heads, concat, return alpha) -> ELU -> conv2.
# --------------------------------------------------------------------------
def gat_forward(x, adj, params, *, heads, hidden, out_ch,
                row_tile=1024, dst_tile=256, dst_tile_alpha=128, src_tile=512,
                alpha_dtype=jnp.bfloat16):
    n = x.shape[0]
    n_pad = _round_up(n, 128)
    pad = n_pad - n
    x_p = jnp.pad(x, ((0, pad), (0, 0)))
    adj_i8 = (adj != 0).astype(jnp.int8)
    adj_p = jnp.pad(adj_i8, ((0, pad), (0, pad)))
    vmem = _vmem_limit_bytes()

    h1, alpha1 = gat_conv(
        x_p, adj_p, params["W1"], params["a_src1"], params["a_dst1"],
        params["b1"], heads=heads, f_out=hidden, n_valid=n,
        apply_input_elu=False, with_alpha=True, alpha_dtype=alpha_dtype,
        row_tile=row_tile, dst_tile=dst_tile_alpha, src_tile=src_tile,
        vmem_limit=vmem)
    # h1 stays padded + lane-dense [N_pad, heads*hidden]; ELU is fused into
    # layer-2's projection kernel; layer-2's alpha is never computed/written.
    h2, _ = gat_conv(
        h1, adj_p, params["W2"], params["a_src2"], params["a_dst2"],
        params["b2"], heads=1, f_out=out_ch, n_valid=n,
        apply_input_elu=True, with_alpha=False, alpha_dtype=alpha_dtype,
        row_tile=row_tile, dst_tile=dst_tile, src_tile=src_tile,
        vmem_limit=vmem)
    return h2[:n], alpha1[:, :n, :n]   # alpha1 == self.attention_weights


# --------------------------------------------------------------------------
# Pure-JAX reference (for a loose-tolerance correctness check).
# --------------------------------------------------------------------------
def _gat_conv_ref(x, adj_mask, w, a_src, a_dst, bias):
    heads = w.shape[0]
    outs, alphas = [], []
    neg = jnp.float32(-1e30)
    for h in range(heads):
        xp = x @ w[h]
        es = xp @ a_src[h]
        ed = xp @ a_dst[h]
        logits = ed[:, None] + es[None, :]
        logits = jnp.where(logits >= 0, logits, 0.2 * logits)
        masked = jnp.where(adj_mask, logits, neg)
        a = jax.nn.softmax(masked, axis=-1)
        a = jnp.where(adj_mask, a, 0.0)
        outs.append(a @ xp + bias[h][None, :])
        alphas.append(a)
    return jnp.concatenate(outs, axis=-1), jnp.stack(alphas)


def _gat_forward_ref(x, adj_mask, params):
    h1, alpha1 = _gat_conv_ref(x, adj_mask, params["W1"], params["a_src1"],
                               params["a_dst1"], params["b1"])
    h1 = jax.nn.elu(h1)
    h2, _ = _gat_conv_ref(h1, adj_mask, params["W2"], params["a_src2"],
                          params["a_dst2"], params["b2"])
    return h2, alpha1


if __name__ == "__main__":
    N, IN_CH, HID, OUT_CH, HEADS = 200, 8, 8, 4, 3

    key = jax.random.PRNGKey(0)
    ks = jax.random.split(key, 8)

    def glorot(k, shape):
        fan_in, fan_out = shape[-2], shape[-1]
        lim = (6.0 / (fan_in + fan_out)) ** 0.5
        return jax.random.uniform(k, shape, jnp.float32, -lim, lim)

    # node features
    x = jax.random.normal(ks[0], (N, IN_CH), jnp.float32)

    # bidirectional ring graph; edge_index[0]=source, edge_index[1]=target
    src = jnp.arange(N, dtype=jnp.int32)
    dst = (src + 1) % N
    edge_index = jnp.stack([jnp.concatenate([src, dst]),
                            jnp.concatenate([dst, src])])        # [2, 2N]

    # dense adjacency A[target, source] = 1, + self-loops (PyG default), int8
    adj = jnp.zeros((N, N), jnp.int8).at[edge_index[1], edge_index[0]].set(1)
    adj = jnp.maximum(adj, jnp.eye(N, dtype=jnp.int8))

    params = {
        "W1": glorot(ks[1], (HEADS, IN_CH, HID)),
        "a_src1": glorot(ks[2], (HEADS, HID)),
        "a_dst1": glorot(ks[3], (HEADS, HID)),
        "b1": jnp.zeros((HEADS, HID), jnp.float32),
        "W2": glorot(ks[4], (1, HEADS * HID, OUT_CH)),
        "a_src2": glorot(ks[5], (1, OUT_CH)),
        "a_dst2": glorot(ks[6], (1, OUT_CH)),
        "b2": jnp.zeros((1, OUT_CH), jnp.float32),
    }

    # Small tiles so the padded N (200 -> 256) exercises multi-step grids:
    # attention grid = (256/64, 256/128) = (4, 2); projection grid = 2.
    out, attn = gat_forward(x, adj, params, heads=HEADS, hidden=HID,
                            out_ch=OUT_CH, row_tile=128, dst_tile=64,
                            dst_tile_alpha=64, src_tile=128)
    jax.block_until_ready((out, attn))
    assert out.shape == (N, OUT_CH)
    assert attn.shape == (HEADS, N, N)
    assert bool(jnp.isfinite(out).all())
    assert bool(jnp.isfinite(attn.astype(jnp.float32)).all())

    # Loose-tolerance check vs. pure-JAX reference (kernel uses bf16 MXU
    # operands and stores alpha in bf16).
    ref_out, ref_alpha = _gat_forward_ref(x, adj > 0, params)
    assert bool(jnp.allclose(out, ref_out, atol=1e-1, rtol=1e-1))
    assert bool(jnp.allclose(attn.astype(jnp.float32), ref_alpha,
                             atol=5e-2, rtol=1e-1))
    # TODO(synk): GAT.decode (link scoring) is not part of forward(); omitted.
    print("KERNEL_OK")
</pallas_src>

<mosaic_0001>
module attributes {stable_mosaic.version = 11 : i64} {
  func.func @_project_kernel(%arg0: i32, %arg1: memref<128x8xf32, #tpu.memory_space<vmem>>, %arg2: memref<8x24xbf16, #tpu.memory_space<vmem>>, %arg3: memref<24x6xf32, #tpu.memory_space<vmem>>, %arg4: memref<128x24xbf16, #tpu.memory_space<vmem>>, %arg5: memref<128x6xf32, #tpu.memory_space<vmem>>) attributes {dimension_semantics = [#tpu.dimension_semantics<parallel>], iteration_bounds = array<i64: 2>, scalar_prefetch = 0 : i64, scratch_operands = 0 : i64, tpu.core_type = #tpu.core_type<tc>, window_params = [{transform_indices = @transform_0, window_bounds = array<i64: 128, 8>}, {pipeline_mode = #tpu.pipeline_mode<synchronous>, transform_indices = @transform_1, window_bounds = array<i64: 8, 24>}, {pipeline_mode = #tpu.pipeline_mode<synchronous>, transform_indices = @transform_2, window_bounds = array<i64: 24, 6>}, {transform_indices = @transform_3, window_bounds = array<i64: 128, 24>}, {transform_indices = @transform_4, window_bounds = array<i64: 128, 6>}]} {
    %c0 = arith.constant 0 : index
    %c0_0 = arith.constant 0 : index
    %0 = vector.load %arg1[%c0, %c0_0] : memref<128x8xf32, #tpu.memory_space<vmem>>, vector<128x8xf32>
    %1 = arith.truncf %0 : vector<128x8xf32> to vector<128x8xbf16>
    %c0_1 = arith.constant 0 : index
    %c0_2 = arith.constant 0 : index
    %2 = vector.load %arg2[%c0_1, %c0_2] : memref<8x24xbf16, #tpu.memory_space<vmem>>, vector<8x24xbf16>
    %cst = arith.constant dense<0.000000e+00> : vector<128x24xf32>
    %3 = tpu.matmul %1, %2, %cst {dimension_numbers = #tpu.dot_dimension_numbers<[1], [0], [0], [1], [0, 0, 1, 1], [], []>} : vector<128x8xbf16>, vector<8x24xbf16>, vector<128x24xf32> -> vector<128x24xf32>
    %4 = arith.truncf %3 : vector<128x24xf32> to vector<128x24xbf16>
    %c0_3 = arith.constant 0 : index
    %c0_4 = arith.constant 0 : index
    %5 = vector.load %arg4[%c0_3, %c0_4] : memref<128x24xbf16, #tpu.memory_space<vmem>>, vector<128x24xbf16>
    tpu.vector_store %arg4[%c0_3, %c0_4], %4 {strides = array<i32>} : memref<128x24xbf16, #tpu.memory_space<vmem>>, vector<128x24xbf16>,
    %c0_5 = arith.constant 0 : index
    %c0_6 = arith.constant 0 : index
    %6 = vector.load %arg3[%c0_5, %c0_6] : memref<24x6xf32, #tpu.memory_space<vmem>>, vector<24x6xf32>
    %cst_7 = arith.constant dense<0.000000e+00> : vector<128x6xf32>
    %7 = tpu.matmul %3, %6, %cst_7 {dimension_numbers = #tpu.dot_dimension_numbers<[1], [0], [0], [1], [0, 0, 1, 1], [], []>} : vector<128x24xf32>, vector<24x6xf32>, vector<128x6xf32> -> vector<128x6xf32>
    %c0_8 = arith.constant 0 : index
    %c0_9 = arith.constant 0 : index
    %8 = vector.load %arg5[%c0_8, %c0_9] : memref<128x6xf32, #tpu.memory_space<vmem>>, vector<128x6xf32>
    tpu.vector_store %arg5[%c0_8, %c0_9], %7 {strides = array<i32>} : memref<128x6xf32, #tpu.memory_space<vmem>>, vector<128x6xf32>,
    return
  }
  func.func @transform_0(%arg0: i32) -> (i32, i32) {
    %c0_i32 = arith.constant 0 : i32
    %c0_i32_0 = arith.constant 0 : i32
    return %arg0, %c0_i32 : i32, i32
  }
  func.func @transform_1(%arg0: i32) -> (i32, i32) {
    %c0_i32 = arith.constant 0 : i32
    %c0_i32_0 = arith.constant 0 : i32
    %c0_i32_1 = arith.constant 0 : i32
    return %c0_i32, %c0_i32_0 : i32, i32
  }
  func.func @transform_2(%arg0: i32) -> (i32, i32) {
    %c0_i32 = arith.constant 0 : i32
    %c0_i32_0 = arith.constant 0 : i32
    %c0_i32_1 = arith.constant 0 : i32
    return %c0_i32, %c0_i32_0 : i32, i32
  }
  func.func @transform_3(%arg0: i32) -> (i32, i32) {
    %c0_i32 = arith.constant 0 : i32
    %c0_i32_0 = arith.constant 0 : i32
    return %arg0, %c0_i32 : i32, i32
  }
  func.func @transform_4(%arg0: i32) -> (i32, i32) {
    %c0_i32 = arith.constant 0 : i32
    %c0_i32_0 = arith.constant 0 : i32
    return %arg0, %c0_i32 : i32, i32
  }
}

</mosaic_0001>

<bundles_post_ra>
// kernel: tpu_custom_call.1
= control target key start
LH: loop header
LB: loop body
LE: loop exit
PB: predicated region body
PF: predicated region fallthrough
CT: control target
= control target key end

     0   :  { %s943_s15 = smov 0   ;;  %s1093_s0 = inlined_call_operand.vmem [shape: f32[256,8], index: 0, kind: input, shape index: {}]   ;;  %s1094_s1 = inlined_call_operand.vmem [shape: bf16[8,24], index: 1, kind: input, shape index: {}]   ;;  %s1095_s2 = inlined_call_operand.vmem [shape: f32[24,6], index: 2, kind: input, shape index: {}]   ;;  %s1096_s3 = inlined_call_operand.vmem [shape: bf16[256,24], index: 3, kind: output, shape index: {0}]   ;;  %s1097_s4 = inlined_call_operand.vmem [shape: f32[256,6], index: 4, kind: output, shape index: {1}]  }
   0x1 LB: > { %s752_s16 = sadd.s32 4294967295, %s916_s15   ;;  %p756_p0 = scmp.ge.s32.totalorder %s916_s15, 1  ;;  %s916_s15 = sphi %s943_s15, %s15_s15  }
   0x2   : > { %p166_p1 = scmp.lt.s32.totalorder %s916_s15, 3 }
   0x4   : > { %p167_p2 = pnand %p756_p0, %p166_p1 }
   0x5   : > { %v240_v0 = vld [vmem:[%s1094_s1] sm:$0xf] (!%p167_p2)  ;;  %vm266_vm0 = vcmask (!%p167_p2), 1043456   ;;  %s757_s19 = sshll.u32 (!%p167_p2), %s752_s16, 4  ;;  %v449_v3 = vld [vmem:[%s1095_s2 + $0x8] sm:$0xff] (!%p167_p2)  ;;  %vm241_vm1 = vcmask (!%p167_p2), 64512  }
   0x6   : > { %170 = sbr.rel (%p167_p2) target bundleno = 477 (0x1dd), region = 32  ;;  %v448_v1 = vld [vmem:[%s1095_s2] sm:$0xff] (!%p167_p2)  ;;  %901 = vmatprep.subr.msk.bf16.mxu0 (!%p167_p2), %vm266_vm0, %v240_v0  ;;  %v268_v2 = vsel (!%p167_p2), %vm266_vm0, %v240_v0, 0  ;;  %p198_p3 = scmp.lt.s32.totalorder (!%p167_p2), %s757_s19, 31  ;;  %v450_v29 = vld [vmem:[%s1095_s2 + $0x10] sm:$0xff] (!%p167_p2)  ;;  %vm451_vm2 = vcmask (!%p167_p2), 195584  }
   0x7   : > { %850 = vmatpush3.bf16.msra.mxu0 (!%p167_p2), %v268_v2  ;;  %v897_v4 = vpack.c.bf16 (!%p167_p2), %v449_v3, %v448_v1  ;;  %vm431_vm3 = vcmask (!%p167_p2), 191488   ;;  %vm645_vm4 = vcmask (!%p167_p2), 48128  }
   0x9   : > { %898 = vmatprep.subr.bf16.mxu1 (!%p167_p2), %v897_v4 }
   0xa   : > { %900 = vmatpush3.bf16.msra.mxu1 (!%p167_p2), %v897_v4 }
   0xb   : > { %871 = vmatprep.subr.mxu1 (!%p167_p2), %v450_v29 }
   0xd   : > { %s1099_s19 = smov (!%p198_p3, %s757_s19), 31 }
   0xe   : > { %s758_s24 = sshll.u32 %s1099_s19, 3  ;;  %872 = vmatpush3.msra.mxu1 %v450_v29  ;;  %s760_s30 = sshll.u32 %s1099_s19, 2 }
   0xf   : > { %s968_s27 = scalar_lea.vmem %s1093_s0, %s758_s24  ;;  %s1001_s7 = scalar_lea.vmem %s1096_s3, %s760_s30 }
  0x10   : > { %v216_v5 = vld [vmem:[%s968_s27] sm:$0xff]  ;;  %v217_v6 = vld [vmem:[%s968_s27 + $0x8] sm:$0xff]  ;;  %v218_v7 = vld [vmem:[%s968_s27 + $0x10] sm:$0xff]  ;;  %s1056_s10 = scalar_lea.vmem %s1097_s4, %s758_s24 }
  0x11   : > { %v232_v8 = vpack.c.bf16 %v217_v6, %v216_v5  ;;  %v219_v9 = vld [vmem:[%s968_s27 + $0x18] sm:$0xff]  ;;  %v220_v10 = vld [vmem:[%s968_s27 + $0x20] sm:$0xff]  ;;  %v221_v11 = vld [vmem:[%s968_s27 + $0x28] sm:$0xff] }
  0x12   : > { %v233_v12 = vpack.c.bf16 %v219_v9, %v218_v7  ;;  %v234_v13 = vpack.c.bf16 %v221_v11, %v220_v10  ;;  %v222_v14 = vld [vmem:[%s968_s27 + $0x30] sm:$0xff]  ;;  %v223_v15 = vld [vmem:[%s968_s27 + $0x38] sm:$0xff]  ;;  %v224_v16 = vld [vmem:[%s968_s27 + $0x40] sm:$0xff] }
  0x13   : > { %851 = vmatprep.mubr.msk.bf16.mxu0 %vm241_vm1, %v232_v8  ;;  %v225_v17 = vld [vmem:[%s968_s27 + $0x48] sm:$0xff]  ;;  %v235_v18 = vpack.c.bf16 %v223_v15, %v222_v14  ;;  %v226_v20 = vld [vmem:[%s968_s27 + $0x50] sm:$0xff]  ;;  %v227_v21 = vld [vmem:[%s968_s27 + $0x58] sm:$0xff] }
  0x14   : > { %852 = vmatmul.mubr.msk.bf16.vlgmr.msra.gmra.mrb[0].mxu0 %vm241_vm1, %v233_v12  ;;  %v236_v19 = vpack.c.bf16 %v225_v17, %v224_v16  ;;  %v228_v22 = vld [vmem:[%s968_s27 + $0x60] sm:$0xff]  ;;  %v229_v23 = vld [vmem:[%s968_s27 + $0x68] sm:$0xff]  ;;  %v237_v24 = vpack.c.bf16 %v227_v21, %v226_v20  ;;  %v230_v26 = vld [vmem:[%s968_s27 + $0x70] sm:$0xff] }
  0x15   : > { %855 = vmatprep.mubr.msk.bf16.mxu0 %vm241_vm1, %v234_v13  ;;  %v238_v25 = vpack.c.bf16 %v229_v23, %v228_v22  ;;  %v231_v27 = vld [vmem:[%s968_s27 + $0x78] sm:$0xff] }
  0x16   : > { %v239_v28 = vpack.c.bf16 %v231_v27, %v230_v26 }
  0x1c   : > { %856 = vmatmul.mubr.msk.bf16.gmra.mrb[4].mxu0 %vm241_vm1, %v235_v18 }
  0x1d   : > { %859 = vmatprep.mubr.msk.bf16.mxu0 %vm241_vm1, %v236_v19 }
  0x24   : > { %860 = vmatmul.mubr.msk.bf16.gmra.mrb[8].mxu0 %vm241_vm1, %v237_v24 }
  0x25   : > { %863 = vmatprep.mubr.msk.bf16.mxu0 %vm241_vm1, %v238_v25 }
  0x2c   : > { %864 = vmatmul.mubr.msk.bf16.gmra.mrb[12].mxu0 %vm241_vm1, %v239_v28 }
  0xe7   : > { %v853_v30 = vpop.f32.mrb[0].mxu0 }
  0xe8   : > { %v807_v31 = vpack.c.bf16 %v853_v30, %v853_v30  ;;  %v304_v32 = vpop.f32.mrb[1].mxu0 }
  0xe9   : > { %v805_v33 = vpack.c.bf16 %v304_v32, %v304_v32  ;;  %v854_v34 = vpop.f32.mrb[2].mxu0  ;;  %873 = vmatprep.mubr.msk.f32.mxu1 %vm451_vm2, %v304_v32 }
  0xea   : > { %434 = vst.msk [vmem:[%s1001_s7 + $0x8] sm:$0xf] %vm431_vm3, %v807_v31  ;;  %v808_v35 = vpack.c.bf16 %v854_v34, %v854_v34  ;;  %v307_v36 = vpop.f32.mrb[3].mxu0 }
  0xeb   : > { %432 = vst.msk [vmem:[%s1001_s7] sm:$0xf] %vm431_vm3, %v805_v33  ;;  %v806_v37 = vpack.c.bf16 %v307_v36, %v307_v36  ;;  %874 = vmatmul.mubr.msk.f32.vlgmr.msra.gmra.mrb[0].mxu1 %vm451_vm2, %v307_v36 }
  0xec   : > { %435 = vst.msk [vmem:[%s1001_s7 + $0xc] sm:$0xf] %vm431_vm3, %v808_v35  ;;  %876 = vmatprep.mubr.msk.f32.mxu1 %vm451_vm2, %v853_v30 }
  0xed   : > { %433 = vst.msk [vmem:[%s1001_s7 + $0x4] sm:$0xf] %vm431_vm3, %v806_v37 }
  0xef   : > { %v857_v38 = vpop.f32.mrb[4].mxu0  ;;  %877 = vmatmul.mubr.msk.f32.gmra.mrb[2].mxu1 %vm451_vm2, %v854_v34 }
  0xf0   : > { %v811_v39 = vpack.c.bf16 %v857_v38, %v857_v38  ;;  %v320_v40 = vpop.f32.mrb[5].mxu0 }
  0xf1   : > { %v809_v41 = vpack.c.bf16 %v320_v40, %v320_v40  ;;  %v858_v42 = vpop.f32.mrb[6].mxu0  ;;  %879 = vmatprep.mubr.msk.f32.mxu1 %vm451_vm2, %v320_v40 }
  0xf2   : > { %438 = vst.msk [vmem:[%s1001_s7 + $0x18] sm:$0xf] %vm431_vm3, %v811_v39  ;;  %v812_v43 = vpack.c.bf16 %v858_v42, %v858_v42  ;;  %v323_v44 = vpop.f32.mrb[7].mxu0 }
  0xf3   : > { %436 = vst.msk [vmem:[%s1001_s7 + $0x10] sm:$0xf] %vm431_vm3, %v809_v41  ;;  %v810_v45 = vpack.c.bf16 %v323_v44, %v323_v44  ;;  %880 = vmatmul.mubr.msk.f32.gmra.mrb[4].mxu1 %vm451_vm2, %v323_v44 }
  0xf4   : > { %439 = vst.msk [vmem:[%s1001_s7 + $0x1c] sm:$0xf] %vm431_vm3, %v812_v43  ;;  %882 = vmatprep.mubr.msk.f32.mxu1 %vm451_vm2, %v857_v38 }
  0xf5   : > { %437 = vst.msk [vmem:[%s1001_s7 + $0x14] sm:$0xf] %vm431_vm3, %v810_v45 }
  0xf7   : > { %v861_v46 = vpop.f32.mrb[8].mxu0  ;;  %883 = vmatmul.mubr.msk.f32.gmra.mrb[6].mxu1 %vm451_vm2, %v858_v42 }
  0xf8   : > { %v815_v47 = vpack.c.bf16 %v861_v46, %v861_v46  ;;  %v336_v48 = vpop.f32.mrb[9].mxu0 }
  0xf9   : > { %v813_v49 = vpack.c.bf16 %v336_v48, %v336_v48  ;;  %v862_v50 = vpop.f32.mrb[10].mxu0  ;;  %885 = vmatprep.mubr.msk.f32.mxu1 %vm451_vm2, %v336_v48 }
  0xfa   : > { %442 = vst.msk [vmem:[%s1001_s7 + $0x28] sm:$0xf] %vm431_vm3, %v815_v47  ;;  %v816_v51 = vpack.c.bf16 %v862_v50, %v862_v50  ;;  %v339_v52 = vpop.f32.mrb[11].mxu0 }
  0xfb   : > { %440 = vst.msk [vmem:[%s1001_s7 + $0x20] sm:$0xf] %vm431_vm3, %v813_v49  ;;  %v814_v53 = vpack.c.bf16 %v339_v52, %v339_v52  ;;  %886 = vmatmul.mubr.msk.f32.gmra.mrb[8].mxu1 %vm451_vm2, %v339_v52 }
  0xfc   : > { %443 = vst.msk [vmem:[%s1001_s7 + $0x2c] sm:$0xf] %vm431_vm3, %v816_v51  ;;  %888 = vmatprep.mubr.msk.f32.mxu1 %vm451_vm2, %v861_v46 }
  0xfd   : > { %441 = vst.msk [vmem:[%s1001_s7 + $0x24] sm:$0xf] %vm431_vm3, %v814_v53 }
  0xff   : > { %v865_v54 = vpop.f32.mrb[12].mxu0  ;;  %889 = vmatmul.mubr.msk.f32.gmra.mrb[10].mxu1 %vm451_vm2, %v862_v50 }
 0x100   : > { %v819_v55 = vpack.c.bf16 %v865_v54, %v865_v54  ;;  %v352_v56 = vpop.f32.mrb[13].mxu0 }
 0x101   : > { %v817_v57 = vpack.c.bf16 %v352_v56, %v352_v56  ;;  %v866_v58 = vpop.f32.mrb[14].mxu0  ;;  %891 = vmatprep.mubr.msk.f32.mxu1 %vm451_vm2, %v352_v56 }
 0x102   : > { %446 = vst.msk [vmem:[%s1001_s7 + $0x38] sm:$0xf] %vm431_vm3, %v819_v55  ;;  %v820_v59 = vpack.c.bf16 %v866_v58, %v866_v58  ;;  %v355_v60 = vpop.f32.mrb[15].mxu0 }
 0x103   : > { %444 = vst.msk [vmem:[%s1001_s7 + $0x30] sm:$0xf] %vm431_vm3, %v817_v57  ;;  %v818_v61 = vpack.c.bf16 %v355_v60, %v355_v60  ;;  %892 = vmatmul.mubr.msk.f32.gmra.mrb[12].mxu1 %vm451_vm2, %v355_v60 }
 0x104   : > { %447 = vst.msk [vmem:[%s1001_s7 + $0x3c] sm:$0xf] %vm431_vm3, %v820_v59  ;;  %894 = vmatprep.mubr.msk.f32.mxu1 %vm451_vm2, %v865_v54 }
 0x105   : > { %445 = vst.msk [vmem:[%s1001_s7 + $0x34] sm:$0xf] %vm431_vm3, %v818_v61 }
 0x107   : > { %895 = vmatmul.mubr.msk.f32.gmra.mrb[14].mxu1 %vm451_vm2, %v866_v58 }
 0x1be   : > { %v875_v62 = vpop.f32.mrb[0].mxu1 }
 0x1bf   : > { %647 = vst.msk [vmem:[%s1056_s10 + $0x8] sm:$0xff] %vm645_vm4, %v875_v62  ;;  %v566_v63 = vpop.f32.mrb[1].mxu1 }
 0x1c0   : > { %646 = vst.msk [vmem:[%s1056_s10] sm:$0xff] %vm645_vm4, %v566_v63 }
 0x1c2   : > { %v878_v0 = vpop.f32.mrb[2].mxu1 }
 0x1c3   : > { %649 = vst.msk [vmem:[%s1056_s10 + $0x18] sm:$0xff] %vm645_vm4, %v878_v0  ;;  %v576_v1 = vpop.f32.mrb[3].mxu1 }
 0x1c4   : > { %648 = vst.msk [vmem:[%s1056_s10 + $0x10] sm:$0xff] %vm645_vm4, %v576_v1 }
 0x1c6   : > { %v881_v2 = vpop.f32.mrb[4].mxu1 }
 0x1c7   : > { %651 = vst.msk [vmem:[%s1056_s10 + $0x28] sm:$0xff] %vm645_vm4, %v881_v2  ;;  %v586_v3 = vpop.f32.mrb[5].mxu1 }
 0x1c8   : > { %650 = vst.msk [vmem:[%s1056_s10 + $0x20] sm:$0xff] %vm645_vm4, %v586_v3 }
 0x1ca   : > { %v884_v4 = vpop.f32.mrb[6].mxu1 }
 0x1cb   : > { %653 = vst.msk [vmem:[%s1056_s10 + $0x38] sm:$0xff] %vm645_vm4, %v884_v4  ;;  %v596_v5 = vpop.f32.mrb[7].mxu1 }
 0x1cc   : > { %652 = vst.msk [vmem:[%s1056_s10 + $0x30] sm:$0xff] %vm645_vm4, %v596_v5 }
 0x1ce   : > { %v887_v6 = vpop.f32.mrb[8].mxu1 }
 0x1cf   : > { %655 = vst.msk [vmem:[%s1056_s10 + $0x48] sm:$0xff] %vm645_vm4, %v887_v6  ;;  %v606_v7 = vpop.f32.mrb[9].mxu1 }
 0x1d0   : > { %654 = vst.msk [vmem:[%s1056_s10 + $0x40] sm:$0xff] %vm645_vm4, %v606_v7 }
 0x1d2   : > { %v890_v8 = vpop.f32.mrb[10].mxu1 }
 0x1d3   : > { %657 = vst.msk [vmem:[%s1056_s10 + $0x58] sm:$0xff] %vm645_vm4, %v890_v8  ;;  %v616_v9 = vpop.f32.mrb[11].mxu1 }
 0x1d4   : > { %656 = vst.msk [vmem:[%s1056_s10 + $0x50] sm:$0xff] %vm645_vm4, %v616_v9 }
 0x1d6   : > { %v893_v10 = vpop.f32.mrb[12].mxu1 }
 0x1d7   : > { %659 = vst.msk [vmem:[%s1056_s10 + $0x68] sm:$0xff] %vm645_vm4, %v893_v10  ;;  %v626_v11 = vpop.f32.mrb[13].mxu1 }
 0x1d8   : > { %658 = vst.msk [vmem:[%s1056_s10 + $0x60] sm:$0xff] %vm645_vm4, %v626_v11 }
 0x1da   : > { %v896_v12 = vpop.f32.mrb[14].mxu1 }
 0x1db   : > { %661 = vst.msk [vmem:[%s1056_s10 + $0x78] sm:$0xff] %vm645_vm4, %v896_v12  ;;  %v636_v13 = vpop.f32.mrb[15].mxu1 }
 0x1dc   : > { %660 = vst.msk [vmem:[%s1056_s10 + $0x70] sm:$0xff] %vm645_vm4, %v636_v13 }
 0x1dd PF: > { %s15_s15 = sadd.s32 1, %s916_s15  }
 0x1de   : > { %p12_p4 = scmp.ge.s32.totalorder %s15_s15, 4  }
 0x1e0   :  { %14 = sbr.rel (!%p12_p4) target bundleno = 1 (0x1), region = 74 }

</bundles_post_ra>
